<compile_context>
chip_gen: v7x
topology: tpu7x:2x2x1
jax: 0.10.0
libtpu: 0.0.40
codegen_flags: <defaults>
</compile_context>

<pallas_src>
import functools

import jax
import jax.numpy as jnp
from jax.experimental import pallas as pl
from jax.experimental.pallas import tpu as pltpu


def _fused_linear_kernel(x_ref, w_ref, o_ref):
    # x_ref : [tb, R*2N]  bf16   (R folded batch rows per matmul row)
    # w_ref : [R*2N, R*N] bf16   (block-diag fused weight, VMEM-resident)
    # o_ref : [tb, R*N]   f32
    o_ref[...] = jnp.dot(
        x_ref[...], w_ref[...], preferred_element_type=jnp.float32
    ).astype(o_ref.dtype)


def _pick_fold(B, N, max_fold=4):
    """Largest fold R in {4,2,1} dividing B; R*N becomes the output lane width."""
    for r in (4, 2, 1):
        if r <= max_fold and B % r == 0:
            return r
    return 1


def _pick_tile(rows, tile_rows):
    """Pick a batch tile that divides `rows` exactly (no padding path).

    Prefers a multiple of 8 (sublane-aligned) <= tile_rows; falls back to the
    full extent (single grid step) if no aligned divisor exists.
    """
    if rows <= tile_rows:
        return rows
    t = (tile_rows // 8) * 8
    while t >= 8:
        if rows % t == 0:
            return t
        t -= 8
    return rows  # ragged prime-ish batch: one full-extent tile, still no pad


def fuse_weights(Ws, Wg, Wu, fold=4):
    """Precompute bf16 W_blk = block_diag(W_eff x fold), W_eff = [Ws.T|Wg.T] @ Wu.T.

    Done once at parameter-init time, reused for every forward call.
    Returns ([fold*2N, fold*N] bf16, fold).
    """
    w_cat = jnp.concatenate([Ws.T, Wg.T], axis=0)        # [2N, Ne]
    w_eff = (w_cat @ Wu.T).astype(jnp.float32)           # [2N, N], fused in f32
    if fold > 1:
        w_eff = jax.scipy.linalg.block_diag(*([w_eff] * fold))
    return w_eff.astype(jnp.bfloat16), fold


@functools.partial(jax.jit, static_argnames=("fold", "tile_rows"))
def linear_independent_forward(inputs, W_blk, *, fold=1, tile_rows=2048):
    """inputs: [B, 2, N] (any float dtype); W_blk: [fold*2N, fold*N] bf16."""
    B, two, N = inputs.shape
    assert two == 2
    assert B % fold == 0
    assert W_blk.shape == (fold * 2 * N, fold * N)

    rows = B // fold
    # Free row-major views: [B, 2N] -> [B/R, R*2N]; bf16 feed for the MXU
    # (no-op cast if the activations already live as bf16 upstream).
    x = inputs.reshape(rows, fold * 2 * N).astype(jnp.bfloat16)

    tb = _pick_tile(rows, tile_rows)
    n_tiles = rows // tb

    out = pl.pallas_call(
        _fused_linear_kernel,
        out_shape=jax.ShapeDtypeStruct((rows, fold * N), jnp.float32),
        grid=(n_tiles,),
        in_specs=[
            pl.BlockSpec((tb, fold * 2 * N), lambda i: (i, 0)),
            # Constant index_map: the tiny fused weight stays VMEM-resident
            # across all grid steps instead of being re-DMA'd per tile.
            pl.BlockSpec((fold * 2 * N, fold * N), lambda i: (0, 0)),
        ],
        out_specs=pl.BlockSpec((tb, fold * N), lambda i: (i, 0)),
        compiler_params=pltpu.CompilerParams(
            # Batch axis is independent -> shards across both v7x TensorCores
            # whenever rows > tile_rows (>= 2 grid steps).
            dimension_semantics=("parallel",),
        ),
    )(x, W_blk)

    # Free row-major view back to [B, N].
    return out.reshape(B, N)


if __name__ == "__main__":
    # Small shapes consistent with the module's forward.
    B = 4            # batch
    num_nodes = 32
    Ne = 16

    key = jax.random.PRNGKey(0)
    k_in, k_ws, k_wg, k_wu = jax.random.split(key, 4)

    inputs = jax.random.normal(k_in, (B, 2, num_nodes), dtype=jnp.float32)

    # Deterministic parameter init (uniform like nn.Linear default, fixed seed).
    def init_linear(k, out_f, in_f):
        bound = 1.0 / (in_f ** 0.5)
        return jax.random.uniform(k, (out_f, in_f), jnp.float32, -bound, bound)

    Ws = init_linear(k_ws, Ne, num_nodes)   # [Ne, num_nodes]
    Wg = init_linear(k_wg, Ne, num_nodes)   # [Ne, num_nodes]
    Wu = init_linear(k_wu, num_nodes, Ne)   # [num_nodes, Ne]

    # Fuse + block-diag fold once (parameter-init time), reuse every call.
    fold = _pick_fold(B, num_nodes)         # 4 here -> 128-lane-dense output
    W_blk, fold = fuse_weights(Ws, Wg, Wu, fold=fold)

    out = linear_independent_forward(inputs, W_blk, fold=fold)
    out = jax.block_until_ready(out)

    # Pure-JAX f32 reference (original three-matmul formulation).
    ref = (inputs[:, 0] @ Ws.T + inputs[:, 1] @ Wg.T) @ Wu.T
    assert out.shape == (B, num_nodes)
    # bf16 MXU feed (activations + fused weight) -> relaxed tolerance vs f32 ref.
    assert jnp.allclose(out, ref, atol=5e-2, rtol=5e-2), "mismatch vs reference"

    print("KERNEL_OK")
</pallas_src>

<mosaic_0001>
module attributes {stable_mosaic.version = 11 : i64} {
  func.func @_fused_linear_kernel(%arg0: i32, %arg1: memref<1x256xbf16, #tpu.memory_space<vmem>>, %arg2: memref<256x128xbf16, #tpu.memory_space<vmem>>, %arg3: memref<1x128xf32, #tpu.memory_space<vmem>>) attributes {dimension_semantics = [#tpu.dimension_semantics<parallel>], iteration_bounds = array<i64: 1>, scalar_prefetch = 0 : i64, scratch_operands = 0 : i64, tpu.core_type = #tpu.core_type<tc>, window_params = [{transform_indices = @transform_0, window_bounds = array<i64: 1, 256>}, {pipeline_mode = #tpu.pipeline_mode<synchronous>, transform_indices = @transform_1, window_bounds = array<i64: 256, 128>}, {transform_indices = @transform_2, window_bounds = array<i64: 1, 128>}]} {
    %c0 = arith.constant 0 : index
    %c0_0 = arith.constant 0 : index
    %0 = vector.load %arg1[%c0, %c0_0] : memref<1x256xbf16, #tpu.memory_space<vmem>>, vector<1x256xbf16>
    %c0_1 = arith.constant 0 : index
    %c0_2 = arith.constant 0 : index
    %1 = vector.load %arg2[%c0_1, %c0_2] : memref<256x128xbf16, #tpu.memory_space<vmem>>, vector<256x128xbf16>
    %cst = arith.constant dense<0.000000e+00> : vector<1x128xf32>
    %2 = tpu.matmul %0, %1, %cst {dimension_numbers = #tpu.dot_dimension_numbers<[1], [0], [0], [1], [0, 0, 1, 1], [], []>} : vector<1x256xbf16>, vector<256x128xbf16>, vector<1x128xf32> -> vector<1x128xf32>
    %c0_3 = arith.constant 0 : index
    %c0_4 = arith.constant 0 : index
    %3 = vector.load %arg3[%c0_3, %c0_4] : memref<1x128xf32, #tpu.memory_space<vmem>>, vector<1x128xf32>
    tpu.vector_store %arg3[%c0_3, %c0_4], %2 {strides = array<i32>} : memref<1x128xf32, #tpu.memory_space<vmem>>, vector<1x128xf32>,
    return
  }
  func.func @transform_0(%arg0: i32) -> (i32, i32) {
    %c0_i32 = arith.constant 0 : i32
    %c0_i32_0 = arith.constant 0 : i32
    return %arg0, %c0_i32 : i32, i32
  }
  func.func @transform_1(%arg0: i32) -> (i32, i32) {
    %c0_i32 = arith.constant 0 : i32
    %c0_i32_0 = arith.constant 0 : i32
    %c0_i32_1 = arith.constant 0 : i32
    return %c0_i32, %c0_i32_0 : i32, i32
  }
  func.func @transform_2(%arg0: i32) -> (i32, i32) {
    %c0_i32 = arith.constant 0 : i32
    %c0_i32_0 = arith.constant 0 : i32
    return %arg0, %c0_i32 : i32, i32
  }
}

</mosaic_0001>

<bundles_post_ra>
// kernel: linear_independent_forward.1
= control target key start
LH: loop header
LB: loop body
LE: loop exit
PB: predicated region body
PF: predicated region fallthrough
CT: control target
= control target key end

     0   :  { %7 = vsyncpa [#allocation3], 0  ;;  %s309_s9 = smov [#allocation2]   ;;  %s346_s0 = inlined_call_operand.vmem [shape: bf16[1,256], index: 0, kind: input, shape index: {}]   ;;  %s347_s1 = inlined_call_operand.hbm [shape: bf16[256,128], index: 1, kind: input, shape index: {}]   ;;  %s348_s2 = inlined_call_operand.vmem [shape: f32[1,128], index: 2, kind: output, shape index: {}]  }
   0x1   :  { %s15_s10 = sshll.u32 %s309_s9, 4  ;;  %s285_s13 = scalar_lea.hbm %s347_s1, 2048  ;;  %s16_s10 = int_to_ptr.vmem [resolvable:$true] %s15_s10 }
   0x2   :  { %p286_p0 = scmp.ne.s32.totalorder %s347_s1, %s285_s13  ;;  %p289_p1 = scmp.lt.u32.totalorder %s285_s13, %s347_s1 }
   0x4   :  { %p291_p2 = pnand %p289_p1, %p286_p0 }
   0x6   :  { %294 = shalt.err (!%p291_p2)
}
   0x7   :  { %s295_s18 = scalar_lea.vmem %s16_s10, 2048  ;;  %p300_p4 = scmp.lt.s32.totalorder %s16_s10, %s16_s10 }
   0x8   :  { %p296_p3 = scmp.ne.s32.totalorder %s16_s10, %s295_s18  ;;  %p301_p5 = scmp.lt.s32.totalorder %s295_s18, %s295_s18 }
   0xa   :  { %p302_p6 = por %p301_p5, %p300_p4 }
   0xc   :  { %p303_p7 = pnand %p302_p6, %p296_p3 }
   0xe   :  { %306 = shalt.err (!%p303_p7)
}
   0xf   :  { %s310_s19 = smov 64   ;;  %s311_s20 = smov 4  }
  0x10   :  { %21 = dma.hbm_to_vmem [thread:$0]  %s347_s1, 2048, %s16_s10, [#allocation3], %s310_s19, %s310_s19, %s311_s20  }
  0x11   :  { %307 = dma.done.wait [#allocation3], 2048  }
  0x12   :  { %308 = vsyncadd [#allocation3], 4294965248  ;;  %v269_v0 = vld [vmem:[#allocation2 + $0x40] sm:$0xff]   ;;  %v271_v2 = vld [vmem:[#allocation2 + $0x48] sm:$0xff]   ;;  %v312_v6 = vmov 1966171168   ;;  %v71_v8 = vlaneseq }
  0x13   :  { %v270_v1 = vld [vmem:[#allocation2] sm:$0xff]   ;;  %243 = vmatprep.subr.bf16.mxu0 %v269_v0  ;;  %v272_v3 = vld [vmem:[#allocation2 + $0x8] sm:$0xff]   ;;  %v273_v4 = vld [vmem:[#allocation2 + $0x50] sm:$0xff]   ;;  %v69_v7 = vunpack.c.l.s4 %v312_v6 }
  0x14   :  { %244 = vmatpush3.bf16.msra.mxu0 %v270_v1  ;;  %v274_v5 = vld [vmem:[#allocation2 + $0x10] sm:$0xff]   ;;  %v275_v9 = vld [vmem:[#allocation2 + $0x58] sm:$0xff]   ;;  %v72_v12 = vshrl.u32 %v71_v8, 7  ;;  %v277_v13 = vld [vmem:[#allocation2 + $0x60] sm:$0xff]  }
  0x15   :  { %245 = vmatprep.subr.bf16.mxu0 %v271_v2  ;;  %v276_v10 = vld [vmem:[#allocation2 + $0x18] sm:$0xff]   ;;  %v70_v11 = vunpack.c.0.s8 %v69_v7  ;;  %v278_v14 = vld [vmem:[#allocation2 + $0x20] sm:$0xff]   ;;  %v279_v16 = vld [vmem:[#allocation2 + $0x68] sm:$0xff]  }
  0x16   :  { %v226_v17 = vld.sshfl [vmem:[%s346_s0] sm:$0x11 pattern:$0x75316420]  ;;  %v280_v19 = vld [vmem:[#allocation2 + $0x28] sm:$0xff]   ;;  %v281_v21 = vld [vmem:[#allocation2 + $0x70] sm:$0xff]  }
  0x17   :  { %v73_v15 = vsub.s32 %v70_v11, %v72_v12  ;;  %v67_v18 = vcombine.high %v226_v17, %v226_v17  ;;  %v282_v22 = vld [vmem:[#allocation2 + $0x30] sm:$0xff]   ;;  %v283_v23 = vld [vmem:[#allocation2 + $0x78] sm:$0xff]  }
  0x18   :  { %246 = vmatpush3.bf16.msra.mxu0 %v272_v3  ;;  %v284_v24 = vld [vmem:[#allocation2 + $0x38] sm:$0xff]  }
  0x19   :  { %247 = vmatprep.subr.bf16.mxu0 %v273_v4  ;;  %v81_v20 = vrot.slane %v67_v18, %v73_v15  ;;  %v74_v25 = vrot.slane %v226_v17, %v73_v15 }
  0x1b   :  { %212 = vmatprep.mubr.bf16.mxu0 %v81_v20 }
  0x1c   :  { %248 = vmatpush3.bf16.msra.mxu0 %v274_v5 }
  0x1d   :  { %249 = vmatprep.subr.bf16.mxu0 %v275_v9 }
  0x20   :  { %250 = vmatpush3.bf16.msra.mxu0 %v276_v10 }
  0x21   :  { %251 = vmatprep.subr.bf16.mxu0 %v277_v13 }
  0x24   :  { %252 = vmatpush3.bf16.msra.mxu0 %v278_v14 }
  0x25   :  { %253 = vmatprep.subr.bf16.mxu0 %v279_v16 }
  0x28   :  { %254 = vmatpush3.bf16.msra.mxu0 %v280_v19 }
  0x29   :  { %255 = vmatprep.subr.bf16.mxu0 %v281_v21 }
  0x2c   :  { %256 = vmatpush3.bf16.msra.mxu0 %v282_v22 }
  0x2d   :  { %257 = vmatprep.subr.bf16.mxu0 %v283_v23 }
  0x30   :  { %258 = vmatpush3.bf16.msra.mxu0 %v284_v24 }
  0x33   :  { %213 = vmatmul.mubr.bf16.vlgmr.msra.gmra.mrb[0].mxu0 %v74_v25 }
 0x106   :  { %v259_v26 = vpop.f32.mrb[0].mxu0 }
 0x107   :  { %v260_v27 = vpop.f32.mrb[1].mxu0 }
 0x108   :  { %v261_v28 = vadd.f32 %v260_v27, %v259_v26  ;;  %v262_v29 = vpop.f32.mrb[2].mxu0 }
 0x109   :  { %v263_v30 = vpop.f32.mrb[3].mxu0 }
 0x10a   :  { %220 = vst [vmem:[%s348_s2] sm:$0x1] %v261_v28 }
 0x10b   :  { %225 = vsyncpa [#allocation3], 1 }

</bundles_post_ra>
